<compile_context>
chip_gen: v7x
topology: tpu7x:2x2x1
jax: 0.10.0
libtpu: 0.0.40
codegen_flags: <defaults>
</compile_context>

<pallas_src>
import math
import jax
import jax.numpy as jnp
from jax.experimental import pallas as pl
from jax.experimental.pallas import tpu as pltpu


UNROLL = 8  # recurrence unroll factor == sublane block height


def lstm2pred_kernel(x_ref, wih_ref, whh_ref, b_ref, wlin_ref, blin_ref,
                     out_ref, xproj_ref):
    """Single-program kernel: whole (padded) sequence resident in VMEM.

    x_ref:     (T_pad, I)       input sequence (rows >= T are zero padding)
    wih_ref:   (I, 4H)          W_ih^T, gate columns ordered i | f | o | g
    whh_ref:   (H, 4H)          W_hh^T, gate columns ordered i | f | o | g
    b_ref:     (1, 4H)          b_ih + b_hh, same column order
    wlin_ref:  (H, O_pad)       W_lin^T zero-padded to a lane-dense width
    blin_ref:  (1, O_pad)       b_lin zero-padded
    out_ref:   (T_pad, O_pad)
    xproj_ref: (T_pad, 4H)      scratch: input projections for all steps
    """
    T = x_ref.shape[0]                 # padded, multiple of UNROLL (static)
    H = whh_ref.shape[0]

    # Batched input projection (+ folded bias) for all timesteps: one MXU matmul.
    xproj_ref[...] = (
        jnp.dot(x_ref[...], wih_ref[...], preferred_element_type=jnp.float32)
        + b_ref[...]
    )

    # Hoist loop-invariant weight loads out of the serial recurrence.
    whh = whh_ref[...]                 # (H, 4H)
    wlin = wlin_ref[...]               # (H, O_pad)
    blin = blin_ref[...]               # (1, O_pad)

    def cell(h, c, gates):
        # gates: (1, 4H), columns i | f | o | g
        sig = jax.nn.sigmoid(gates[:, 0:3 * H])      # one EUP slab: i, f, o
        g_g = jnp.tanh(gates[:, 3 * H:4 * H])        # one EUP slab: g
        c_new = sig[:, H:2 * H] * c + sig[:, 0:H] * g_g
        h_new = sig[:, 2 * H:3 * H] * jnp.tanh(c_new)
        return h_new, c_new

    def block(blk, carry):
        h, c = carry
        base = blk * UNROLL
        if not isinstance(base, int):                # dynamic index: alignment hint
            base = pl.multiple_of(base, UNROLL)
        xp = xproj_ref[pl.ds(base, UNROLL), :]       # (UNROLL, 4H), one load
        rows = []
        for u in range(UNROLL):                      # unrolled at trace time
            gates = xp[u:u + 1, :] + jnp.dot(
                h, whh, preferred_element_type=jnp.float32)      # (1, 4H)
            h, c = cell(h, c, gates)
            rows.append(h)
        h_blk = jnp.concatenate(rows, axis=0)        # (UNROLL, H), stays in vregs
        # Fused final Linear per block -> lane-dense (UNROLL, O_pad) unmasked store.
        out_ref[pl.ds(base, UNROLL), :] = (
            jnp.dot(h_blk, wlin, preferred_element_type=jnp.float32) + blin
        )
        return h, c

    h0 = jnp.zeros((1, H), jnp.float32)
    c0 = jnp.zeros((1, H), jnp.float32)
    nblk = T // UNROLL                               # static Python int
    if nblk <= 8:
        # Small static T: fully unroll the recurrence at trace time.
        carry = (h0, c0)
        for blk in range(nblk):
            carry = block(blk, carry)
    else:
        # Large T: serial loop over 8-step unrolled blocks.
        jax.lax.fori_loop(0, nblk, block, (h0, c0))


def lstm2pred_forward(seq, w_ih, w_hh, b_ih, b_hh, w_lin, b_lin):
    """seq: (T, input_size). Weights in PyTorch convention:
       w_ih (4H, I), w_hh (4H, H), b_ih (4H,), b_hh (4H,),
       w_lin (O, H), b_lin (O,). PyTorch gate row order is i, f, g, o."""
    T, I = seq.shape
    H = w_hh.shape[1]
    O = w_lin.shape[0]

    # Reorder gates i,f,g,o (PyTorch) -> i,f,o,g so one sigmoid covers i|f|o.
    perm = jnp.concatenate([jnp.arange(0, H), jnp.arange(H, 2 * H),
                            jnp.arange(3 * H, 4 * H), jnp.arange(2 * H, 3 * H)])
    wih_t = jnp.transpose(w_ih[perm]).astype(jnp.float32)          # (I, 4H)
    whh_t = jnp.transpose(w_hh[perm]).astype(jnp.float32)          # (H, 4H)
    b = (b_ih + b_hh)[perm].reshape(1, 4 * H).astype(jnp.float32)  # (1, 4H)

    # Lane-dense output: pad O up to a multiple of 128 (sliced off below).
    O_pad = ((O + 127) // 128) * 128
    wlin_t = jnp.zeros((H, O_pad), jnp.float32).at[:, :O].set(
        jnp.transpose(w_lin).astype(jnp.float32))                  # (H, O_pad)
    blin = jnp.zeros((1, O_pad), jnp.float32).at[:, :O].set(
        b_lin.reshape(1, O).astype(jnp.float32))                   # (1, O_pad)

    # Pad T to a multiple of the unroll factor; extra steps are computed on
    # zero inputs after the real sequence and sliced off.
    T_pad = ((T + UNROLL - 1) // UNROLL) * UNROLL
    x = jnp.zeros((T_pad, I), jnp.float32).at[:T].set(seq.astype(jnp.float32))

    vmem = pl.BlockSpec(memory_space=pltpu.MemorySpace.VMEM)
    out_pad = pl.pallas_call(
        lstm2pred_kernel,
        out_shape=jax.ShapeDtypeStruct((T_pad, O_pad), jnp.float32),
        in_specs=[vmem] * 6,
        out_specs=vmem,
        scratch_shapes=[pltpu.VMEM((T_pad, 4 * H), jnp.float32)],
    )(x, wih_t, whh_t, b, wlin_t, blin)
    return out_pad[:T, :O]


def lstm2pred_reference(seq, w_ih, w_hh, b_ih, b_hh, w_lin, b_lin):
    """Pure-JAX reference matching PyTorch nn.LSTM / nn.Linear semantics."""
    H = w_hh.shape[1]

    def step(carry, x_t):
        h, c = carry
        gates = x_t @ w_ih.T + b_ih + h @ w_hh.T + b_hh
        i = jax.nn.sigmoid(gates[0:H])
        f = jax.nn.sigmoid(gates[H:2 * H])
        g = jnp.tanh(gates[2 * H:3 * H])
        o = jax.nn.sigmoid(gates[3 * H:4 * H])
        c_new = f * c + i * g
        h_new = o * jnp.tanh(c_new)
        return (h_new, c_new), h_new

    init = (jnp.zeros((H,), jnp.float32), jnp.zeros((H,), jnp.float32))
    _, hs = jax.lax.scan(step, init, seq)
    return hs @ w_lin.T + b_lin


if __name__ == "__main__":
    # Small shapes consistent with the module's forward: seq is (T, input_size).
    T, input_size, hidden_size, output_size = 8, 16, 32, 8

    key = jax.random.PRNGKey(0)
    ks = jax.random.split(key, 7)
    k_lstm = 1.0 / math.sqrt(hidden_size)

    w_ih = jax.random.uniform(ks[0], (4 * hidden_size, input_size),
                              jnp.float32, -k_lstm, k_lstm)
    w_hh = jax.random.uniform(ks[1], (4 * hidden_size, hidden_size),
                              jnp.float32, -k_lstm, k_lstm)
    b_ih = jax.random.uniform(ks[2], (4 * hidden_size,), jnp.float32,
                              -k_lstm, k_lstm)
    b_hh = jax.random.uniform(ks[3], (4 * hidden_size,), jnp.float32,
                              -k_lstm, k_lstm)
    w_lin = jax.random.uniform(ks[4], (output_size, hidden_size), jnp.float32,
                               -k_lstm, k_lstm)
    b_lin = jax.random.uniform(ks[5], (output_size,), jnp.float32,
                               -k_lstm, k_lstm)

    seq = jax.random.normal(ks[6], (T, input_size), jnp.float32)

    out = lstm2pred_forward(seq, w_ih, w_hh, b_ih, b_hh, w_lin, b_lin)
    out = jax.block_until_ready(out)

    ref = lstm2pred_reference(seq, w_ih, w_hh, b_ih, b_hh, w_lin, b_lin)
    assert out.shape == (T, output_size)
    assert jnp.allclose(out, ref, atol=1e-5, rtol=1e-5), "mismatch vs reference"

    print("KERNEL_OK")
</pallas_src>

<mosaic_0001>
module attributes {stable_mosaic.version = 11 : i64} {
  func.func @lstm2pred_kernel(%arg0: memref<8x16xf32, #tpu.memory_space<vmem>>, %arg1: memref<16x128xf32, #tpu.memory_space<vmem>>, %arg2: memref<32x128xf32, #tpu.memory_space<vmem>>, %arg3: memref<1x128xf32, #tpu.memory_space<vmem>>, %arg4: memref<32x128xf32, #tpu.memory_space<vmem>>, %arg5: memref<1x128xf32, #tpu.memory_space<vmem>>, %arg6: memref<8x128xf32, #tpu.memory_space<vmem>>, %arg7: memref<8x128xf32, #tpu.memory_space<vmem>>) attributes {dimension_semantics = [], scalar_prefetch = 0 : i64, scratch_operands = 1 : i64, tpu.core_type = #tpu.core_type<tc>} {
    %c0 = arith.constant 0 : index
    %c0_0 = arith.constant 0 : index
    %0 = vector.load %arg0[%c0, %c0_0] : memref<8x16xf32, #tpu.memory_space<vmem>>, vector<8x16xf32>
    %c0_1 = arith.constant 0 : index
    %c0_2 = arith.constant 0 : index
    %1 = vector.load %arg1[%c0_1, %c0_2] : memref<16x128xf32, #tpu.memory_space<vmem>>, vector<16x128xf32>
    %cst = arith.constant dense<0.000000e+00> : vector<8x128xf32>
    %2 = tpu.matmul %0, %1, %cst {dimension_numbers = #tpu.dot_dimension_numbers<[1], [0], [0], [1], [0, 0, 1, 1], [], []>} : vector<8x16xf32>, vector<16x128xf32>, vector<8x128xf32> -> vector<8x128xf32>
    %c0_3 = arith.constant 0 : index
    %c0_4 = arith.constant 0 : index
    %3 = vector.load %arg3[%c0_3, %c0_4] : memref<1x128xf32, #tpu.memory_space<vmem>>, vector<1x128xf32>
    %4 = vector.broadcast %3 : vector<1x128xf32> to vector<8x128xf32>
    %5 = arith.addf %2, %4 : vector<8x128xf32>
    %c0_5 = arith.constant 0 : index
    %c0_6 = arith.constant 0 : index
    %6 = vector.load %arg7[%c0_5, %c0_6] : memref<8x128xf32, #tpu.memory_space<vmem>>, vector<8x128xf32>
    tpu.vector_store %arg7[%c0_5, %c0_6], %5 {strides = array<i32>} : memref<8x128xf32, #tpu.memory_space<vmem>>, vector<8x128xf32>,
    %c0_7 = arith.constant 0 : index
    %c0_8 = arith.constant 0 : index
    %7 = vector.load %arg2[%c0_7, %c0_8] : memref<32x128xf32, #tpu.memory_space<vmem>>, vector<32x128xf32>
    %c0_9 = arith.constant 0 : index
    %c0_10 = arith.constant 0 : index
    %8 = vector.load %arg4[%c0_9, %c0_10] : memref<32x128xf32, #tpu.memory_space<vmem>>, vector<32x128xf32>
    %c0_11 = arith.constant 0 : index
    %c0_12 = arith.constant 0 : index
    %9 = vector.load %arg5[%c0_11, %c0_12] : memref<1x128xf32, #tpu.memory_space<vmem>>, vector<1x128xf32>
    %cst_13 = arith.constant 0.000000e+00 : f32
    %10 = vector.broadcast %cst_13 : f32 to vector<1x32xf32>
    %cst_14 = arith.constant 0.000000e+00 : f32
    %11 = vector.broadcast %cst_14 : f32 to vector<1x32xf32>
    %c0_15 = arith.constant 0 : index
    %c0_16 = arith.constant 0 : index
    %12 = vector.load %arg7[%c0_15, %c0_16] : memref<8x128xf32, #tpu.memory_space<vmem>>, vector<8x128xf32>
    %13 = vector.extract_strided_slice %12 {offsets = [0, 0], sizes = [1, 128], strides = [1, 1]} : vector<8x128xf32> to vector<1x128xf32>
    %cst_17 = arith.constant dense<0.000000e+00> : vector<1x128xf32>
    %14 = tpu.matmul %10, %7, %cst_17 {dimension_numbers = #tpu.dot_dimension_numbers<[1], [0], [0], [1], [0, 0, 1, 1], [], []>} : vector<1x32xf32>, vector<32x128xf32>, vector<1x128xf32> -> vector<1x128xf32>
    %15 = arith.addf %13, %14 : vector<1x128xf32>
    %16 = vector.extract_strided_slice %15 {offsets = [0, 0], sizes = [1, 96], strides = [1, 1]} : vector<1x128xf32> to vector<1x96xf32>
    %17 = arith.negf %16 : vector<1x96xf32>
    %18 = math.exp %17 : vector<1x96xf32>
    %cst_18 = arith.constant 1.000000e+00 : f32
    %19 = vector.broadcast %cst_18 : f32 to vector<1x96xf32>
    %20 = arith.addf %19, %18 : vector<1x96xf32>
    %21 = arith.divf %19, %20 : vector<1x96xf32>
    %22 = vector.extract_strided_slice %15 {offsets = [0, 96], sizes = [1, 32], strides = [1, 1]} : vector<1x128xf32> to vector<1x32xf32>
    %23 = math.tanh %22 : vector<1x32xf32>
    %24 = vector.extract_strided_slice %21 {offsets = [0, 32], sizes = [1, 32], strides = [1, 1]} : vector<1x96xf32> to vector<1x32xf32>
    %25 = arith.mulf %24, %11 : vector<1x32xf32>
    %26 = vector.extract_strided_slice %21 {offsets = [0, 0], sizes = [1, 32], strides = [1, 1]} : vector<1x96xf32> to vector<1x32xf32>
    %27 = arith.mulf %26, %23 : vector<1x32xf32>
    %28 = arith.addf %25, %27 : vector<1x32xf32>
    %29 = vector.extract_strided_slice %21 {offsets = [0, 64], sizes = [1, 32], strides = [1, 1]} : vector<1x96xf32> to vector<1x32xf32>
    %30 = math.tanh %28 : vector<1x32xf32>
    %31 = arith.mulf %29, %30 : vector<1x32xf32>
    %32 = vector.extract_strided_slice %12 {offsets = [1, 0], sizes = [1, 128], strides = [1, 1]} : vector<8x128xf32> to vector<1x128xf32>
    %cst_19 = arith.constant dense<0.000000e+00> : vector<1x128xf32>
    %33 = tpu.matmul %31, %7, %cst_19 {dimension_numbers = #tpu.dot_dimension_numbers<[1], [0], [0], [1], [0, 0, 1, 1], [], []>} : vector<1x32xf32>, vector<32x128xf32>, vector<1x128xf32> -> vector<1x128xf32>
    %34 = arith.addf %32, %33 : vector<1x128xf32>
    %35 = vector.extract_strided_slice %34 {offsets = [0, 0], sizes = [1, 96], strides = [1, 1]} : vector<1x128xf32> to vector<1x96xf32>
    %36 = arith.negf %35 : vector<1x96xf32>
    %37 = math.exp %36 : vector<1x96xf32>
    %cst_20 = arith.constant 1.000000e+00 : f32
    %38 = vector.broadcast %cst_20 : f32 to vector<1x96xf32>
    %39 = arith.addf %38, %37 : vector<1x96xf32>
    %40 = arith.divf %38, %39 : vector<1x96xf32>
    %41 = vector.extract_strided_slice %34 {offsets = [0, 96], sizes = [1, 32], strides = [1, 1]} : vector<1x128xf32> to vector<1x32xf32>
    %42 = math.tanh %41 : vector<1x32xf32>
    %43 = vector.extract_strided_slice %40 {offsets = [0, 32], sizes = [1, 32], strides = [1, 1]} : vector<1x96xf32> to vector<1x32xf32>
    %44 = arith.mulf %43, %28 : vector<1x32xf32>
    %45 = vector.extract_strided_slice %40 {offsets = [0, 0], sizes = [1, 32], strides = [1, 1]} : vector<1x96xf32> to vector<1x32xf32>
    %46 = arith.mulf %45, %42 : vector<1x32xf32>
    %47 = arith.addf %44, %46 : vector<1x32xf32>
    %48 = vector.extract_strided_slice %40 {offsets = [0, 64], sizes = [1, 32], strides = [1, 1]} : vector<1x96xf32> to vector<1x32xf32>
    %49 = math.tanh %47 : vector<1x32xf32>
    %50 = arith.mulf %48, %49 : vector<1x32xf32>
    %51 = vector.extract_strided_slice %12 {offsets = [2, 0], sizes = [1, 128], strides = [1, 1]} : vector<8x128xf32> to vector<1x128xf32>
    %cst_21 = arith.constant dense<0.000000e+00> : vector<1x128xf32>
    %52 = tpu.matmul %50, %7, %cst_21 {dimension_numbers = #tpu.dot_dimension_numbers<[1], [0], [0], [1], [0, 0, 1, 1], [], []>} : vector<1x32xf32>, vector<32x128xf32>, vector<1x128xf32> -> vector<1x128xf32>
    %53 = arith.addf %51, %52 : vector<1x128xf32>
    %54 = vector.extract_strided_slice %53 {offsets = [0, 0], sizes = [1, 96], strides = [1, 1]} : vector<1x128xf32> to vector<1x96xf32>
    %55 = arith.negf %54 : vector<1x96xf32>
    %56 = math.exp %55 : vector<1x96xf32>
    %cst_22 = arith.constant 1.000000e+00 : f32
    %57 = vector.broadcast %cst_22 : f32 to vector<1x96xf32>
    %58 = arith.addf %57, %56 : vector<1x96xf32>
    %59 = arith.divf %57, %58 : vector<1x96xf32>
    %60 = vector.extract_strided_slice %53 {offsets = [0, 96], sizes = [1, 32], strides = [1, 1]} : vector<1x128xf32> to vector<1x32xf32>
    %61 = math.tanh %60 : vector<1x32xf32>
    %62 = vector.extract_strided_slice %59 {offsets = [0, 32], sizes = [1, 32], strides = [1, 1]} : vector<1x96xf32> to vector<1x32xf32>
    %63 = arith.mulf %62, %47 : vector<1x32xf32>
    %64 = vector.extract_strided_slice %59 {offsets = [0, 0], sizes = [1, 32], strides = [1, 1]} : vector<1x96xf32> to vector<1x32xf32>
    %65 = arith.mulf %64, %61 : vector<1x32xf32>
    %66 = arith.addf %63, %65 : vector<1x32xf32>
    %67 = vector.extract_strided_slice %59 {offsets = [0, 64], sizes = [1, 32], strides = [1, 1]} : vector<1x96xf32> to vector<1x32xf32>
    %68 = math.tanh %66 : vector<1x32xf32>
    %69 = arith.mulf %67, %68 : vector<1x32xf32>
    %70 = vector.extract_strided_slice %12 {offsets = [3, 0], sizes = [1, 128], strides = [1, 1]} : vector<8x128xf32> to vector<1x128xf32>
    %cst_23 = arith.constant dense<0.000000e+00> : vector<1x128xf32>
    %71 = tpu.matmul %69, %7, %cst_23 {dimension_numbers = #tpu.dot_dimension_numbers<[1], [0], [0], [1], [0, 0, 1, 1], [], []>} : vector<1x32xf32>, vector<32x128xf32>, vector<1x128xf32> -> vector<1x128xf32>
    %72 = arith.addf %70, %71 : vector<1x128xf32>
    %73 = vector.extract_strided_slice %72 {offsets = [0, 0], sizes = [1, 96], strides = [1, 1]} : vector<1x128xf32> to vector<1x96xf32>
    %74 = arith.negf %73 : vector<1x96xf32>
    %75 = math.exp %74 : vector<1x96xf32>
    %cst_24 = arith.constant 1.000000e+00 : f32
    %76 = vector.broadcast %cst_24 : f32 to vector<1x96xf32>
    %77 = arith.addf %76, %75 : vector<1x96xf32>
    %78 = arith.divf %76, %77 : vector<1x96xf32>
    %79 = vector.extract_strided_slice %72 {offsets = [0, 96], sizes = [1, 32], strides = [1, 1]} : vector<1x128xf32> to vector<1x32xf32>
    %80 = math.tanh %79 : vector<1x32xf32>
    %81 = vector.extract_strided_slice %78 {offsets = [0, 32], sizes = [1, 32], strides = [1, 1]} : vector<1x96xf32> to vector<1x32xf32>
    %82 = arith.mulf %81, %66 : vector<1x32xf32>
    %83 = vector.extract_strided_slice %78 {offsets = [0, 0], sizes = [1, 32], strides = [1, 1]} : vector<1x96xf32> to vector<1x32xf32>
    %84 = arith.mulf %83, %80 : vector<1x32xf32>
    %85 = arith.addf %82, %84 : vector<1x32xf32>
    %86 = vector.extract_strided_slice %78 {offsets = [0, 64], sizes = [1, 32], strides = [1, 1]} : vector<1x96xf32> to vector<1x32xf32>
    %87 = math.tanh %85 : vector<1x32xf32>
    %88 = arith.mulf %86, %87 : vector<1x32xf32>
    %89 = vector.extract_strided_slice %12 {offsets = [4, 0], sizes = [1, 128], strides = [1, 1]} : vector<8x128xf32> to vector<1x128xf32>
    %cst_25 = arith.constant dense<0.000000e+00> : vector<1x128xf32>
    %90 = tpu.matmul %88, %7, %cst_25 {dimension_numbers = #tpu.dot_dimension_numbers<[1], [0], [0], [1], [0, 0, 1, 1], [], []>} : vector<1x32xf32>, vector<32x128xf32>, vector<1x128xf32> -> vector<1x128xf32>
    %91 = arith.addf %89, %90 : vector<1x128xf32>
    %92 = vector.extract_strided_slice %91 {offsets = [0, 0], sizes = [1, 96], strides = [1, 1]} : vector<1x128xf32> to vector<1x96xf32>
    %93 = arith.negf %92 : vector<1x96xf32>
    %94 = math.exp %93 : vector<1x96xf32>
    %cst_26 = arith.constant 1.000000e+00 : f32
    %95 = vector.broadcast %cst_26 : f32 to vector<1x96xf32>
    %96 = arith.addf %95, %94 : vector<1x96xf32>
    %97 = arith.divf %95, %96 : vector<1x96xf32>
    %98 = vector.extract_strided_slice %91 {offsets = [0, 96], sizes = [1, 32], strides = [1, 1]} : vector<1x128xf32> to vector<1x32xf32>
    %99 = math.tanh %98 : vector<1x32xf32>
    %100 = vector.extract_strided_slice %97 {offsets = [0, 32], sizes = [1, 32], strides = [1, 1]} : vector<1x96xf32> to vector<1x32xf32>
    %101 = arith.mulf %100, %85 : vector<1x32xf32>
    %102 = vector.extract_strided_slice %97 {offsets = [0, 0], sizes = [1, 32], strides = [1, 1]} : vector<1x96xf32> to vector<1x32xf32>
    %103 = arith.mulf %102, %99 : vector<1x32xf32>
    %104 = arith.addf %101, %103 : vector<1x32xf32>
    %105 = vector.extract_strided_slice %97 {offsets = [0, 64], sizes = [1, 32], strides = [1, 1]} : vector<1x96xf32> to vector<1x32xf32>
    %106 = math.tanh %104 : vector<1x32xf32>
    %107 = arith.mulf %105, %106 : vector<1x32xf32>
    %108 = vector.extract_strided_slice %12 {offsets = [5, 0], sizes = [1, 128], strides = [1, 1]} : vector<8x128xf32> to vector<1x128xf32>
    %cst_27 = arith.constant dense<0.000000e+00> : vector<1x128xf32>
    %109 = tpu.matmul %107, %7, %cst_27 {dimension_numbers = #tpu.dot_dimension_numbers<[1], [0], [0], [1], [0, 0, 1, 1], [], []>} : vector<1x32xf32>, vector<32x128xf32>, vector<1x128xf32> -> vector<1x128xf32>
    %110 = arith.addf %108, %109 : vector<1x128xf32>
    %111 = vector.extract_strided_slice %110 {offsets = [0, 0], sizes = [1, 96], strides = [1, 1]} : vector<1x128xf32> to vector<1x96xf32>
    %112 = arith.negf %111 : vector<1x96xf32>
    %113 = math.exp %112 : vector<1x96xf32>
    %cst_28 = arith.constant 1.000000e+00 : f32
    %114 = vector.broadcast %cst_28 : f32 to vector<1x96xf32>
    %115 = arith.addf %114, %113 : vector<1x96xf32>
    %116 = arith.divf %114, %115 : vector<1x96xf32>
    %117 = vector.extract_strided_slice %110 {offsets = [0, 96], sizes = [1, 32], strides = [1, 1]} : vector<1x128xf32> to vector<1x32xf32>
    %118 = math.tanh %117 : vector<1x32xf32>
    %119 = vector.extract_strided_slice %116 {offsets = [0, 32], sizes = [1, 32], strides = [1, 1]} : vector<1x96xf32> to vector<1x32xf32>
    %120 = arith.mulf %119, %104 : vector<1x32xf32>
    %121 = vector.extract_strided_slice %116 {offsets = [0, 0], sizes = [1, 32], strides = [1, 1]} : vector<1x96xf32> to vector<1x32xf32>
    %122 = arith.mulf %121, %118 : vector<1x32xf32>
    %123 = arith.addf %120, %122 : vector<1x32xf32>
    %124 = vector.extract_strided_slice %116 {offsets = [0, 64], sizes = [1, 32], strides = [1, 1]} : vector<1x96xf32> to vector<1x32xf32>
    %125 = math.tanh %123 : vector<1x32xf32>
    %126 = arith.mulf %124, %125 : vector<1x32xf32>
    %127 = vector.extract_strided_slice %12 {offsets = [6, 0], sizes = [1, 128], strides = [1, 1]} : vector<8x128xf32> to vector<1x128xf32>
    %cst_29 = arith.constant dense<0.000000e+00> : vector<1x128xf32>
    %128 = tpu.matmul %126, %7, %cst_29 {dimension_numbers = #tpu.dot_dimension_numbers<[1], [0], [0], [1], [0, 0, 1, 1], [], []>} : vector<1x32xf32>, vector<32x128xf32>, vector<1x128xf32> -> vector<1x128xf32>
    %129 = arith.addf %127, %128 : vector<1x128xf32>
    %130 = vector.extract_strided_slice %129 {offsets = [0, 0], sizes = [1, 96], strides = [1, 1]} : vector<1x128xf32> to vector<1x96xf32>
    %131 = arith.negf %130 : vector<1x96xf32>
    %132 = math.exp %131 : vector<1x96xf32>
    %cst_30 = arith.constant 1.000000e+00 : f32
    %133 = vector.broadcast %cst_30 : f32 to vector<1x96xf32>
    %134 = arith.addf %133, %132 : vector<1x96xf32>
    %135 = arith.divf %133, %134 : vector<1x96xf32>
    %136 = vector.extract_strided_slice %129 {offsets = [0, 96], sizes = [1, 32], strides = [1, 1]} : vector<1x128xf32> to vector<1x32xf32>
    %137 = math.tanh %136 : vector<1x32xf32>
    %138 = vector.extract_strided_slice %135 {offsets = [0, 32], sizes = [1, 32], strides = [1, 1]} : vector<1x96xf32> to vector<1x32xf32>
    %139 = arith.mulf %138, %123 : vector<1x32xf32>
    %140 = vector.extract_strided_slice %135 {offsets = [0, 0], sizes = [1, 32], strides = [1, 1]} : vector<1x96xf32> to vector<1x32xf32>
    %141 = arith.mulf %140, %137 : vector<1x32xf32>
    %142 = arith.addf %139, %141 : vector<1x32xf32>
    %143 = vector.extract_strided_slice %135 {offsets = [0, 64], sizes = [1, 32], strides = [1, 1]} : vector<1x96xf32> to vector<1x32xf32>
    %144 = math.tanh %142 : vector<1x32xf32>
    %145 = arith.mulf %143, %144 : vector<1x32xf32>
    %146 = vector.extract_strided_slice %12 {offsets = [7, 0], sizes = [1, 128], strides = [1, 1]} : vector<8x128xf32> to vector<1x128xf32>
    %cst_31 = arith.constant dense<0.000000e+00> : vector<1x128xf32>
    %147 = tpu.matmul %145, %7, %cst_31 {dimension_numbers = #tpu.dot_dimension_numbers<[1], [0], [0], [1], [0, 0, 1, 1], [], []>} : vector<1x32xf32>, vector<32x128xf32>, vector<1x128xf32> -> vector<1x128xf32>
    %148 = arith.addf %146, %147 : vector<1x128xf32>
    %149 = vector.extract_strided_slice %148 {offsets = [0, 0], sizes = [1, 96], strides = [1, 1]} : vector<1x128xf32> to vector<1x96xf32>
    %150 = arith.negf %149 : vector<1x96xf32>
    %151 = math.exp %150 : vector<1x96xf32>
    %cst_32 = arith.constant 1.000000e+00 : f32
    %152 = vector.broadcast %cst_32 : f32 to vector<1x96xf32>
    %153 = arith.addf %152, %151 : vector<1x96xf32>
    %154 = arith.divf %152, %153 : vector<1x96xf32>
    %155 = vector.extract_strided_slice %148 {offsets = [0, 96], sizes = [1, 32], strides = [1, 1]} : vector<1x128xf32> to vector<1x32xf32>
    %156 = math.tanh %155 : vector<1x32xf32>
    %157 = vector.extract_strided_slice %154 {offsets = [0, 32], sizes = [1, 32], strides = [1, 1]} : vector<1x96xf32> to vector<1x32xf32>
    %158 = arith.mulf %157, %142 : vector<1x32xf32>
    %159 = vector.extract_strided_slice %154 {offsets = [0, 0], sizes = [1, 32], strides = [1, 1]} : vector<1x96xf32> to vector<1x32xf32>
    %160 = arith.mulf %159, %156 : vector<1x32xf32>
    %161 = arith.addf %158, %160 : vector<1x32xf32>
    %162 = vector.extract_strided_slice %154 {offsets = [0, 64], sizes = [1, 32], strides = [1, 1]} : vector<1x96xf32> to vector<1x32xf32>
    %163 = math.tanh %161 : vector<1x32xf32>
    %164 = arith.mulf %162, %163 : vector<1x32xf32>
    %165 = tpu.concatenate %31, %50, %69, %88, %107, %126, %145, %164 in 0 : vector<1x32xf32>, vector<1x32xf32>, vector<1x32xf32>, vector<1x32xf32>, vector<1x32xf32>, vector<1x32xf32>, vector<1x32xf32>, vector<1x32xf32> -> vector<8x32xf32>
    %cst_33 = arith.constant dense<0.000000e+00> : vector<8x128xf32>
    %166 = tpu.matmul %165, %8, %cst_33 {dimension_numbers = #tpu.dot_dimension_numbers<[1], [0], [0], [1], [0, 0, 1, 1], [], []>} : vector<8x32xf32>, vector<32x128xf32>, vector<8x128xf32> -> vector<8x128xf32>
    %167 = vector.broadcast %9 : vector<1x128xf32> to vector<8x128xf32>
    %168 = arith.addf %166, %167 : vector<8x128xf32>
    %c0_34 = arith.constant 0 : index
    %c0_35 = arith.constant 0 : index
    %169 = vector.load %arg6[%c0_34, %c0_35] : memref<8x128xf32, #tpu.memory_space<vmem>>, vector<8x128xf32>
    tpu.vector_store %arg6[%c0_34, %c0_35], %168 {strides = array<i32>} : memref<8x128xf32, #tpu.memory_space<vmem>>, vector<8x128xf32>,
    return
  }
}

</mosaic_0001>

<bundles_post_ra>
// kernel: tpu_custom_call.1
= control target key start
LH: loop header
LB: loop body
LE: loop exit
PB: predicated region body
PF: predicated region fallthrough
CT: control target
= control target key end

     0   :  { %11 = vsyncpa [#allocation4], 0  ;;  %s1792_s0 = inlined_call_operand.hbm [shape: f32[8,16], index: 0, kind: input, shape index: {}]   ;;  %s1793_s1 = inlined_call_operand.hbm [shape: f32[16,128], index: 1, kind: input, shape index: {}]   ;;  %s1794_s2 = inlined_call_operand.hbm [shape: f32[32,128], index: 2, kind: input, shape index: {}]   ;;  %s1795_s3 = inlined_call_operand.vmem [shape: f32[1,128], index: 3, kind: input, shape index: {}]   ;;  %s1796_s4 = inlined_call_operand.hbm [shape: f32[32,128], index: 4, kind: input, shape index: {}]   ;;  %s1797_s5 = inlined_call_operand.vmem [shape: f32[1,128], index: 5, kind: input, shape index: {}]   ;;  %s1798_s6 = inlined_call_operand.hbm [shape: f32[8,128], index: 6, kind: output, shape index: {}]  }
   0x1   :  { %12 = vsyncpa [#allocation7], 0 }
   0x2   :  { %13 = vsyncpa [#allocation10], 0 }
   0x3   :  { %14 = vsyncpa [#allocation5], 0  ;;  %s1556_s21 = smov [#allocation6]   ;;  %s1438_s25 = scalar_lea.hbm %s1793_s1, 256 }
   0x4   :  { %s30_s22 = sshll.u32 %s1556_s21, 4  ;;  %p1439_p0 = scmp.ne.s32.totalorder %s1793_s1, %s1438_s25  ;;  %s31_s22 = int_to_ptr.vmem [resolvable:$true] %s30_s22 }
   0x5   :  { %p1442_p1 = scmp.lt.u32.totalorder %s1438_s25, %s1793_s1 }
   0x7   :  { %p1444_p2 = pnand %p1442_p1, %p1439_p0 }
   0x9   :  { %1447 = shalt.err (!%p1444_p2)
}
   0xa   :  { %s1448_s30 = scalar_lea.vmem %s31_s22, 256  ;;  %p1453_p4 = scmp.lt.s32.totalorder %s31_s22, %s31_s22 }
   0xb   :  { %p1449_p3 = scmp.ne.s32.totalorder %s31_s22, %s1448_s30  ;;  %p1454_p5 = scmp.lt.s32.totalorder %s1448_s30, %s1448_s30 }
   0xd   :  { %p1455_p6 = por %p1454_p5, %p1453_p4 }
   0xf   :  { %p1456_p7 = pnand %p1455_p6, %p1449_p3 }
  0x11   :  { %1459 = shalt.err (!%p1456_p7)
}
  0x12   :  { %s1557_s7 = smov 128   ;;  %s1558_s8 = smov 8  }
  0x13   :  { %36 = dma.hbm_to_vmem [thread:$0]  %s1793_s1, 256, %s31_s22, [#allocation7], %s1557_s7, %s1557_s7, %s1558_s8  }
  0x14   :  { %s1559_s11 = smov [#allocation3]   ;;  %s1560_s13 = smov [#allocation8]  }
  0x15   :  { %s21_s12 = sshll.u32 %s1559_s11, 4  ;;  %s42_s14 = sshll.u32 %s1560_s13, 4  ;;  %s22_s12 = int_to_ptr.vmem [resolvable:$true] %s21_s12  ;;  %s43_s14 = int_to_ptr.vmem [resolvable:$true] %s42_s14 }
  0x16   :  { %s1460_s17 = scalar_lea.hbm %s1792_s0, 128 }
  0x17   :  { %p1461_p8 = scmp.ne.s32.totalorder %s1792_s0, %s1460_s17  ;;  %p1464_p9 = scmp.lt.u32.totalorder %s1460_s17, %s1792_s0 }
  0x19   :  { %p1466_p10 = pnand %p1464_p9, %p1461_p8 }
  0x1b   :  { %1469 = shalt.err (!%p1466_p10)
}
  0x1c   :  { %s1470_s1 = scalar_lea.vmem %s22_s12, 128  ;;  %p1475_p12 = scmp.lt.s32.totalorder %s22_s12, %s22_s12 }
  0x1d   :  { %p1471_p11 = scmp.ne.s32.totalorder %s22_s12, %s1470_s1  ;;  %p1476_p13 = scmp.lt.s32.totalorder %s1470_s1, %s1470_s1 }
  0x1f   :  { %p1477_p0 = por %p1476_p13, %p1475_p12 }
  0x21   :  { %p1478_p1 = pnand %p1477_p0, %p1471_p11 }
  0x23   :  { %1481 = shalt.err (!%p1478_p1)
}
  0x24   :  { %24 = dma.hbm_to_vmem [thread:$0]  %s1792_s0, 128, %s22_s12, [#allocation4]  }
  0x25   :  { %s1482_s26 = scalar_lea.hbm %s1794_s2, 512 }
  0x26   :  { %p1483_p2 = scmp.ne.s32.totalorder %s1794_s2, %s1482_s26  ;;  %p1486_p3 = scmp.lt.u32.totalorder %s1482_s26, %s1794_s2 }
  0x28   :  { %p1488_p4 = pnand %p1486_p3, %p1483_p2 }
  0x2a   :  { %1491 = shalt.err (!%p1488_p4)
}
  0x2b   :  { %s1492_s9 = scalar_lea.vmem %s43_s14, 512  ;;  %p1497_p6 = scmp.lt.s32.totalorder %s43_s14, %s43_s14 }
  0x2c   :  { %p1493_p5 = scmp.ne.s32.totalorder %s43_s14, %s1492_s9  ;;  %p1498_p7 = scmp.lt.s32.totalorder %s1492_s9, %s1492_s9 }
  0x2e   :  { %p1499_p8 = por %p1498_p7, %p1497_p6 }
  0x30   :  { %p1500_p9 = pnand %p1499_p8, %p1493_p5 }
  0x32   :  { %1503 = shalt.err (!%p1500_p9)
}
  0x33   :  { %48 = dma.hbm_to_vmem [thread:$0]  %s1794_s2, 512, %s43_s14, [#allocation7], %s1557_s7, %s1557_s7, %s1558_s8  }
  0x34   :  { %s1561_s11 = smov [#allocation9]   ;;  %s1504_s16 = scalar_lea.hbm %s1796_s4, 512 }
  0x35   :  { %s56_s12 = sshll.u32 %s1561_s11, 4  ;;  %p1505_p10 = scmp.ne.s32.totalorder %s1796_s4, %s1504_s16  ;;  %s57_s12 = int_to_ptr.vmem [resolvable:$true] %s56_s12 }
  0x36   :  { %p1508_p11 = scmp.lt.u32.totalorder %s1504_s16, %s1796_s4 }
  0x38   :  { %p1510_p12 = pnand %p1508_p11, %p1505_p10 }
  0x3a   :  { %1513 = shalt.err (!%p1510_p12)
}
  0x3b   :  { %s1514_s21 = scalar_lea.vmem %s57_s12, 512  ;;  %p1519_p0 = scmp.lt.s32.totalorder %s57_s12, %s57_s12 }
  0x3c   :  { %p1515_p13 = scmp.ne.s32.totalorder %s57_s12, %s1514_s21  ;;  %p1520_p1 = scmp.lt.s32.totalorder %s1514_s21, %s1514_s21 }
  0x3e   :  { %p1521_p2 = por %p1520_p1, %p1519_p0 }
  0x40   :  { %p1522_p3 = pnand %p1521_p2, %p1515_p13 }
  0x42   :  { %1525 = shalt.err (!%p1522_p3)
}
  0x43   :  { %62 = dma.hbm_to_vmem [thread:$0]  %s1796_s4, 512, %s57_s12, [#allocation10], %s1557_s7, %s1557_s7, %s1558_s8  }
  0x44   :  { %1548 = dma.done.wait [#allocation4], 128  }
  0x45   :  { %1549 = vsyncadd [#allocation4], 4294967168 }
  0x46   :  { %1550 = dma.done.wait [#allocation7], 768  }
  0x47   :  { %1551 = vsyncadd [#allocation7], 4294966528 }
  0x48   :  { %1552 = dma.done.wait [#allocation10], 512  }
  0x49   :  { %1553 = vsyncadd [#allocation10], 4294966784  ;;  %v1562_v0 = vmov 0.0|0.0   ;;  %vm1563_vm0 = vmmov 0   ;;  %v1564_v1 = vmov 0.0   ;;  %v162_v2 = vld [vmem:[#allocation8] sm:$0xff] }
  0x4a   :  { %1308 = vmatprep.subr.bf16.mxu1 %v1562_v0  ;;  %1305 = vmatprep.subr.bf16.mxu0 %v1562_v0  ;;  %v163_v3 = vld [vmem:[#allocation8 + $0x8] sm:$0xff]  ;;  %v78_v4 = vld [vmem:[#allocation6] sm:$0xff]  ;;  %v79_v6 = vld [vmem:[#allocation6 + $0x8] sm:$0xff]  ;;  %vm87_vm1 = vcmask 130048   ;;  %s1565_s8 = smov 32   ;;  %vm172_vm2 = vcmask 261120  }
  0x4b   :  { %1203 = vmatprep.mubr.msk.f32.mxu0 %vm1563_vm0, %v1564_v1  ;;  %1214 = vmatprep.mubr.msk.f32.mxu1 %vm1563_vm0, %v1564_v1  ;;  %v1666_v5 = vpack.c.bf16 %v163_v3, %v162_v2  ;;  %v164_v7 = vld [vmem:[#allocation8 + $0x10] sm:$0xff]  ;;  %v1306_v8 = vpack.c.bf16 %v79_v6, %v78_v4  ;;  %v165_v9 = vld [vmem:[#allocation8 + $0x18] sm:$0xff]  ;;  %v77_v11 = vld [vmem:[#allocation3] sm:$0xff]  ;;  %vm1019_vm3 = vcmask 1040384   ;;  %vm1021_vm4 = vcmask 1041408   ;;  %s1567_s23 = smov [#allocation11]  }
  0x4c   :  { %v1669_v10 = vpack.c.bf16 %v165_v9, %v164_v7  ;;  %v1132_v12 = vld [vmem:[%s1795_s3] ss:$0 sm:$0xff]  ;;  %s1566_s3 = smov 64   ;;  %vm1023_vm5 = vcmask 1042432   ;;  %vm1025_vm6 = vcmask 1043456   ;;  %vm1027_vm7 = vcmask 1044480  }
  0x4d   :  { %1310 = vmatpush3.bf16.msra.mxu1 %v1666_v5  ;;  %1307 = vmatpush3.bf16.msra.mxu0 %v1306_v8  ;;  %vm1029_vm8 = vcmask 1045504   ;;  %vm1031_vm9 = vcmask 1046528   ;;  %s1121_s24 = sshll.u32 %s1567_s23, 4  ;;  %s1122_s24 = int_to_ptr.vmem [resolvable:$true] %s1121_s24 }
  0x4e   :  { %1311 = vmatprep.subr.bf16.mxu1 %v1562_v0  ;;  %1314 = vmatprep.subr.bf16.mxu0 %v1562_v0  ;;  %s1526_s25 = scalar_lea.vmem %s1122_s24, 128  ;;  %p1531_p5 = scmp.lt.s32.totalorder %s1122_s24, %s1122_s24 }
  0x4f   :  { %p1527_p4 = scmp.ne.s32.totalorder %s1122_s24, %s1526_s25  ;;  %p1532_p6 = scmp.lt.s32.totalorder %s1526_s25, %s1526_s25 }
  0x50   :  { %1204 = vmatmul.mubr.msk.f32.vlgmr.msra.gmra.mrb[0].mxu0 %vm87_vm1, %v77_v11 }
  0x51   :  { %1313 = vmatpush3.bf16.msra.mxu1 %v1669_v10  ;;  %1316 = vmatpush3.bf16.msra.mxu0 %v1666_v5  ;;  %p1533_p7 = por %p1532_p6, %p1531_p5 }
  0x52   :  { %1225 = vmatprep.mubr.msk.f32.mxu0 %vm1563_vm0, %v1564_v1  ;;  %1317 = vmatprep.subr.bf16.mxu0 %v1562_v0 }
  0x53   :  { %1320 = vmatprep.subr.bf16.mxu1 %v1562_v0  ;;  %p1534_p8 = pnand %p1533_p7, %p1527_p4 }
  0x54   :  { %1215 = vmatmul.mubr.f32.vlgmr.msra.gmra.mrb[0].mxu1 %v1564_v1 }
  0x55   :  { %1322 = vmatpush3.bf16.msra.mxu1 %v1666_v5  ;;  %1236 = vmatprep.mubr.msk.f32.mxu1 %vm1563_vm0, %v1564_v1 }
  0x56   :  { %1319 = vmatpush3.bf16.msra.mxu0 %v1669_v10  ;;  %1323 = vmatprep.subr.bf16.mxu1 %v1562_v0 }
  0x57   :  { %1326 = vmatprep.subr.bf16.mxu0 %v1562_v0 }
  0x59   :  { %1325 = vmatpush3.bf16.msra.mxu1 %v1669_v10 }
  0x5a   :  { %1332 = vmatprep.subr.bf16.mxu1 %v1562_v0 }
 0x123   :  { %v157_v13 = vpop.f32.mrb[0].mxu0 }
 0x124   :  { %v1691_v14 = vadd.f32 %v1132_v12, %v157_v13  ;;  %v1205_v15 = vpop.f32.mrb[1].mxu0 }
 0x127   :  { %v242_v16 = vpop.f32.mrb[0].mxu1 }
 0x128   :  { %v246_v17 = vadd.f32 %v242_v16, %v1691_v14  ;;  %v1216_v18 = vpop.f32.mrb[1].mxu1 }
 0x12a   :  { %1374 = vtanh.f32 %v246_v17  ;;  %v1134_v20 = vmul.f32 -1.442695, %v246_v17 }
 0x12c   :  { %1376 = vpow2.f32 %v1134_v20 }
 0x134   :  { %v1375_v19 = vpop.eup %1374 }
 0x135   :  { %256 = vrot.lane.b32.xlu0 %v1375_v19, %s1565_s8 }
 0x136   :  { %v1377_v21 = vpop.eup %1376 }
 0x137   :  { %v250_v22 = vadd.f32 1.0, %v1377_v21 }
 0x139   :  { %1378 = vrcp.f32 %v250_v22 }
 0x143   :  { %v1379_v23 = vpop.eup %1378 }
 0x144   :  { %v254_v26 = vmul.f32 0.0, %v1379_v23 }
 0x1a7   :  { %v257_v24 = vpop.permute.xlu0 %256 }
 0x1a8   :  { %v259_v25 = vmul.f32 %v1379_v23, %v257_v24 }
 0x1aa   :  { %261 = vrot.lane.b32.xlu0 %v259_v25, %s1565_s8 }
 0x21c   :  { %v262_v27 = vpop.permute.xlu0 %261 }
 0x21d   :  { %v264_v28 = vadd.f32 %v262_v27, %v254_v26 }
 0x21f   :  { %1380 = vtanh.f32 %v264_v28  ;;  %v358_v44 = vrot.slane %v264_v28, 7 }
 0x229   :  { %v1381_v29 = vpop.eup %1380 }
 0x22a   :  { %267 = vrot.lane.b32.xlu1 %v1381_v29, %s1565_s8 }
 0x29c   :  { %v268_v30 = vpop.permute.xlu1 %267 }
 0x29d   :  { %v1697_v31 = vmul.f32 %v1379_v23, %v268_v30 }
 0x29f   :  { %272 = vrot.lane.b32.xlu1 %v1697_v31, %s1566_s3 }
 0x311   :  { %v273_v32 = vpop.permute.xlu1 %272 }
 0x312   :  { %1226 = vmatmul.mubr.msk.f32.vlgmr.msra.gmra.mrb[2].mxu0 %vm172_vm2, %v273_v32 }
 0x313   :  { %1328 = vmatpush3.bf16.msra.mxu0 %v1666_v5  ;;  %1247 = vmatprep.mubr.msk.f32.mxu0 %vm1563_vm0, %v1564_v1 }
 0x314   :  { %1329 = vmatprep.subr.bf16.mxu0 %v1562_v0 }
 0x317   :  { %1331 = vmatpush3.bf16.msra.mxu0 %v1669_v10 }
 0x318   :  { %1338 = vmatprep.subr.bf16.mxu0 %v1562_v0 }
 0x3e5   :  { %v342_v33 = vpop.f32.mrb[2].mxu0 }
 0x3e6   :  { %v347_v34 = vrot.slane %v342_v33, 7  ;;  %v1227_v35 = vpop.f32.mrb[3].mxu0 }
 0x3e8   :  { %v349_v36 = vadd.f32 %v347_v34, %v1691_v14 }
 0x3ea   :  { %1382 = vtanh.f32 %v349_v36  ;;  %v1136_v38 = vmul.f32 -1.442695, %v349_v36 }
 0x3ec   :  { %1384 = vpow2.f32 %v1136_v38 }
 0x3f4   :  { %v1383_v37 = vpop.eup %1382 }
 0x3f5   :  { %362 = vrot.lane.b32.xlu0 %v1383_v37, %s1565_s8 }
 0x3f6   :  { %v1385_v39 = vpop.eup %1384 }
 0x3f7   :  { %v353_v40 = vadd.f32 1.0, %v1385_v39 }
 0x3f9   :  { %1386 = vrcp.f32 %v353_v40 }
 0x403   :  { %v1387_v41 = vpop.eup %1386 }
 0x404   :  { %v360_v45 = vmul.f32 %v1387_v41, %v358_v44 }
 0x467   :  { %v363_v42 = vpop.permute.xlu0 %362 }
 0x468   :  { %v365_v43 = vmul.f32 %v1387_v41, %v363_v42 }
 0x46a   :  { %367 = vrot.lane.b32.xlu1 %v365_v43, %s1565_s8 }
 0x4dc   :  { %v368_v46 = vpop.permute.xlu1 %367 }
 0x4dd   :  { %v370_v47 = vadd.f32 %v368_v46, %v360_v45 }
 0x4df   :  { %1388 = vtanh.f32 %v370_v47  ;;  %v465_v2 = vrot.slane %v370_v47, 7 }
 0x4e9   :  { %v1389_v48 = vpop.eup %1388 }
 0x4ea   :  { %373 = vrot.lane.b32.xlu0 %v1389_v48, %s1565_s8 }
 0x55c   :  { %v374_v49 = vpop.permute.xlu0 %373 }
 0x55d   :  { %v376_v50 = vmul.f32 %v1387_v41, %v374_v49 }
 0x55f   :  { %v378_v51 = vrot.slane %v376_v50, 1  ;;  %v1020_v11 = vsel %vm1019_vm3, %v1697_v31, %v376_v50 }
 0x561   :  { %379 = vrot.lane.b32.xlu1 %v378_v51, %s1566_s3 }
 0x5d3   :  { %v380_v52 = vpop.permute.xlu1 %379 }
 0x5d4   :  { %1237 = vmatmul.mubr.msk.f32.vlgmr.msra.gmra.mrb[2].mxu1 %vm172_vm2, %v380_v52 }
 0x5d5   :  { %1334 = vmatpush3.bf16.msra.mxu1 %v1666_v5  ;;  %1258 = vmatprep.mubr.msk.f32.mxu1 %vm1563_vm0, %v1564_v1 }
 0x5d6   :  { %1335 = vmatprep.subr.bf16.mxu1 %v1562_v0 }
 0x5d9   :  { %1337 = vmatpush3.bf16.msra.mxu1 %v1669_v10 }
 0x5da   :  { %1344 = vmatprep.subr.bf16.mxu1 %v1562_v0 }
 0x6a7   :  { %v449_v53 = vpop.f32.mrb[2].mxu1 }
 0x6a8   :  { %v454_v54 = vrot.slane %v449_v53, 6  ;;  %v1238_v55 = vpop.f32.mrb[3].mxu1 }
 0x6aa   :  { %v456_v56 = vadd.f32 %v454_v54, %v1691_v14 }
 0x6ac   :  { %1390 = vtanh.f32 %v456_v56  ;;  %v1138_v58 = vmul.f32 -1.442695, %v456_v56 }
 0x6ae   :  { %1392 = vpow2.f32 %v1138_v58 }
 0x6b6   :  { %v1391_v57 = vpop.eup %1390 }
 0x6b7   :  { %469 = vrot.lane.b32.xlu0 %v1391_v57, %s1565_s8 }
 0x6b8   :  { %v1393_v59 = vpop.eup %1392 }
 0x6b9   :  { %v460_v60 = vadd.f32 1.0, %v1393_v59 }
 0x6bb   :  { %1394 = vrcp.f32 %v460_v60 }
 0x6c5   :  { %v1395_v61 = vpop.eup %1394 }
 0x6c6   :  { %v467_v3 = vmul.f32 %v1395_v61, %v465_v2 }
 0x729   :  { %v470_v62 = vpop.permute.xlu0 %469 }
 0x72a   :  { %v472_v63 = vmul.f32 %v1395_v61, %v470_v62 }
 0x72c   :  { %474 = vrot.lane.b32.xlu1 %v472_v63, %s1565_s8 }
 0x79e   :  { %v475_v4 = vpop.permute.xlu1 %474 }
 0x79f   :  { %v477_v6 = vadd.f32 %v475_v4, %v467_v3 }
 0x7a1   :  { %1396 = vtanh.f32 %v477_v6  ;;  %v572_v27 = vrot.slane %v477_v6, 7 }
 0x7ab   :  { %v1397_v7 = vpop.eup %1396 }
 0x7ac   :  { %480 = vrot.lane.b32.xlu0 %v1397_v7, %s1565_s8 }
 0x81e   :  { %v481_v8 = vpop.permute.xlu0 %480 }
 0x81f   :  { %v483_v9 = vmul.f32 %v1395_v61, %v481_v8 }
 0x821   :  { %v485_v12 = vrot.slane %v483_v9, 2  ;;  %v1022_v13 = vsel %vm1021_vm4, %v1020_v11, %v483_v9 }
 0x823   :  { %486 = vrot.lane.b32.xlu1 %v485_v12, %s1566_s3 }
 0x895   :  { %v487_v15 = vpop.permute.xlu1 %486 }
 0x896   :  { %1248 = vmatmul.mubr.msk.f32.vlgmr.msra.gmra.mrb[4].mxu0 %vm172_vm2, %v487_v15 }
 0x897   :  { %1340 = vmatpush3.bf16.msra.mxu0 %v1666_v5  ;;  %1269 = vmatprep.mubr.msk.f32.mxu0 %vm1563_vm0, %v1564_v1 }
 0x898   :  { %1341 = vmatprep.subr.bf16.mxu0 %v1562_v0 }
 0x89b   :  { %1343 = vmatpush3.bf16.msra.mxu0 %v1669_v10 }
 0x89c   :  { %1350 = vmatprep.subr.bf16.mxu0 %v1562_v0 }
 0x969   :  { %v556_v16 = vpop.f32.mrb[4].mxu0 }
 0x96a   :  { %v561_v17 = vrot.slane %v556_v16, 5  ;;  %v1249_v18 = vpop.f32.mrb[5].mxu0 }
 0x96c   :  { %v563_v19 = vadd.f32 %v561_v17, %v1691_v14 }
 0x96e   :  { %1398 = vtanh.f32 %v563_v19  ;;  %v1140_v21 = vmul.f32 -1.442695, %v563_v19 }
 0x970   :  { %1400 = vpow2.f32 %v1140_v21 }
 0x978   :  { %v1399_v20 = vpop.eup %1398 }
 0x979   :  { %576 = vrot.lane.b32.xlu0 %v1399_v20, %s1565_s8 }
 0x97a   :  { %v1401_v22 = vpop.eup %1400 }
 0x97b   :  { %v567_v23 = vadd.f32 1.0, %v1401_v22 }
 0x97d   :  { %1402 = vrcp.f32 %v567_v23 }
 0x987   :  { %v1403_v24 = vpop.eup %1402 }
 0x988   :  { %v574_v28 = vmul.f32 %v1403_v24, %v572_v27 }
 0x9eb   :  { %v577_v25 = vpop.permute.xlu0 %576 }
 0x9ec   :  { %v579_v26 = vmul.f32 %v1403_v24, %v577_v25 }
 0x9ee   :  { %581 = vrot.lane.b32.xlu1 %v579_v26, %s1565_s8 }
 0xa60   :  { %v582_v29 = vpop.permute.xlu1 %581 }
 0xa61   :  { %v584_v30 = vadd.f32 %v582_v29, %v574_v28 }
 0xa63   :  { %1404 = vtanh.f32 %v584_v30  ;;  %v679_v48 = vrot.slane %v584_v30, 7 }
 0xa6d   :  { %v1405_v31 = vpop.eup %1404 }
 0xa6e   :  { %587 = vrot.lane.b32.xlu0 %v1405_v31, %s1565_s8 }
 0xae0   :  { %v588_v32 = vpop.permute.xlu0 %587 }
 0xae1   :  { %v590_v33 = vmul.f32 %v1403_v24, %v588_v32 }
 0xae3   :  { %v592_v34 = vrot.slane %v590_v33, 3  ;;  %v1024_v35 = vsel %vm1023_vm5, %v1022_v13, %v590_v33 }
 0xae5   :  { %593 = vrot.lane.b32.xlu1 %v592_v34, %s1566_s3 }
 0xb57   :  { %v594_v36 = vpop.permute.xlu1 %593 }
 0xb58   :  { %1259 = vmatmul.mubr.msk.f32.vlgmr.msra.gmra.mrb[4].mxu1 %vm172_vm2, %v594_v36 }
 0xb59   :  { %1346 = vmatpush3.bf16.msra.mxu1 %v1666_v5  ;;  %1280 = vmatprep.mubr.msk.f32.mxu1 %vm1563_vm0, %v1564_v1 }
 0xb5a   :  { %1347 = vmatprep.subr.bf16.mxu1 %v1562_v0 }
 0xb5d   :  { %1349 = vmatpush3.bf16.msra.mxu1 %v1669_v10 }
 0xb5e   :  { %1356 = vmatprep.subr.bf16.mxu1 %v1562_v0 }
 0xc2b   :  { %v663_v37 = vpop.f32.mrb[4].mxu1 }
 0xc2c   :  { %v668_v38 = vrot.slane %v663_v37, 4  ;;  %v1260_v39 = vpop.f32.mrb[5].mxu1 }
 0xc2e   :  { %v670_v40 = vadd.f32 %v668_v38, %v1691_v14 }
 0xc30   :  { %1406 = vtanh.f32 %v670_v40  ;;  %v1142_v42 = vmul.f32 -1.442695, %v670_v40 }
 0xc32   :  { %1408 = vpow2.f32 %v1142_v42 }
 0xc3a   :  { %v1407_v41 = vpop.eup %1406 }
 0xc3b   :  { %683 = vrot.lane.b32.xlu0 %v1407_v41, %s1565_s8 }
 0xc3c   :  { %v1409_v43 = vpop.eup %1408 }
 0xc3d   :  { %v674_v44 = vadd.f32 1.0, %v1409_v43 }
 0xc3f   :  { %1410 = vrcp.f32 %v674_v44 }
 0xc49   :  { %v1411_v45 = vpop.eup %1410 }
 0xc4a   :  { %v681_v49 = vmul.f32 %v1411_v45, %v679_v48 }
 0xcad   :  { %v684_v46 = vpop.permute.xlu0 %683 }
 0xcae   :  { %v686_v47 = vmul.f32 %v1411_v45, %v684_v46 }
 0xcb0   :  { %688 = vrot.lane.b32.xlu1 %v686_v47, %s1565_s8 }
 0xd22   :  { %v689_v50 = vpop.permute.xlu1 %688 }
 0xd23   :  { %v691_v51 = vadd.f32 %v689_v50, %v681_v49 }
 0xd25   :  { %1412 = vtanh.f32 %v691_v51 }
 0xd2f   :  { %v1413_v52 = vpop.eup %1412 }
 0xd30   :  { %694 = vrot.lane.b32.xlu0 %v1413_v52, %s1565_s8 }
 0xda2   :  { %v695_v53 = vpop.permute.xlu0 %694 }
 0xda3   :  { %v697_v54 = vmul.f32 %v1411_v45, %v695_v53  ;;  %v167_v53 = vld [vmem:[#allocation9 + $0x8] sm:$0xff] }
 0xda5   :  { %v699_v55 = vrot.slane %v697_v54, 4  ;;  %v1026_v56 = vsel %vm1025_vm6, %v1024_v35, %v697_v54  ;;  %v168_v54 = vld [vmem:[#allocation9 + $0x10] sm:$0xff] }
 0xda7   :  { %700 = vrot.lane.b32.xlu1 %v699_v55, %s1566_s3 }
 0xe19   :  { %v701_v57 = vpop.permute.xlu1 %700 }
 0xe1a   :  { %1270 = vmatmul.mubr.msk.f32.vlgmr.msra.gmra.mrb[6].mxu0 %vm172_vm2, %v701_v57 }
 0xe1b   :  { %1352 = vmatpush3.bf16.msra.mxu0 %v1666_v5  ;;  %1291 = vmatprep.mubr.msk.f32.mxu0 %vm1563_vm0, %v1564_v1 }
 0xe1c   :  { %1353 = vmatprep.subr.bf16.mxu0 %v1562_v0 }
 0xe1f   :  { %1355 = vmatpush3.bf16.msra.mxu0 %v1669_v10  ;;  %v786_v10 = vrot.slane %v691_v51, 7 }
 0xeed   :  { %v770_v58 = vpop.f32.mrb[6].mxu0 }
 0xeee   :  { %v775_v59 = vrot.slane %v770_v58, 3  ;;  %v1271_v60 = vpop.f32.mrb[7].mxu0 }
 0xef0   :  { %v777_v61 = vadd.f32 %v775_v59, %v1691_v14 }
 0xef2   :  { %1414 = vtanh.f32 %v777_v61  ;;  %v1144_v63 = vmul.f32 -1.442695, %v777_v61 }
 0xef4   :  { %1416 = vpow2.f32 %v1144_v63  ;;  %v1149_v63 = vld [vmem:[%s1797_s5] ss:$0 sm:$0xff] }
 0xefc   :  { %v1415_v62 = vpop.eup %1414 }
 0xefd   :  { %790 = vrot.lane.b32.xlu0 %v1415_v62, %s1565_s8 }
 0xefe   :  { %v1417_v2 = vpop.eup %1416 }
 0xeff   :  { %v781_v5 = vadd.f32 1.0, %v1417_v2 }
 0xf01   :  { %1418 = vrcp.f32 %v781_v5 }
 0xf0b   :  { %v1419_v3 = vpop.eup %1418 }
 0xf0c   :  { %v788_v7 = vmul.f32 %v1419_v3, %v786_v10 }
 0xf6f   :  { %v791_v4 = vpop.permute.xlu0 %790 }
 0xf70   :  { %v793_v6 = vmul.f32 %v1419_v3, %v791_v4 }
 0xf72   :  { %795 = vrot.lane.b32.xlu1 %v793_v6, %s1565_s8 }
 0xfe4   :  { %v796_v8 = vpop.permute.xlu1 %795 }
 0xfe5   :  { %v798_v9 = vadd.f32 %v796_v8, %v788_v7 }
 0xfe7   :  { %1420 = vtanh.f32 %v798_v9 }
 0xff1   :  { %v1421_v11 = vpop.eup %1420 }
 0xff2   :  { %801 = vrot.lane.b32.xlu0 %v1421_v11, %s1565_s8 }
0x1064   :  { %v802_v12 = vpop.permute.xlu0 %801 }
0x1065   :  { %v804_v13 = vmul.f32 %v1419_v3, %v802_v12 }
0x1067   :  { %v806_v15 = vrot.slane %v804_v13, 5  ;;  %v1028_v16 = vsel %vm1027_vm7, %v1026_v56, %v804_v13  ;;  %v169_v56 = vld [vmem:[#allocation9 + $0x18] sm:$0xff] }
0x1068   :  { %v1360_v57 = vpack.c.bf16 %v169_v56, %v168_v54 }
0x1069   :  { %807 = vrot.lane.b32.xlu1 %v806_v15, %s1566_s3 }
0x10db   :  { %v808_v17 = vpop.permute.xlu1 %807 }
0x10dc   :  { %1281 = vmatmul.mubr.msk.f32.vlgmr.msra.gmra.mrb[6].mxu1 %vm172_vm2, %v808_v17 }
0x10dd   :  { %1302 = vmatprep.mubr.msk.f32.mxu1 %vm1563_vm0, %v1564_v1  ;;  %v893_v1 = vrot.slane %v798_v9, 7 }
0x11af   :  { %v877_v18 = vpop.f32.mrb[6].mxu1 }
0x11b0   :  { %v882_v19 = vrot.slane %v877_v18, 2  ;;  %v1282_v20 = vpop.f32.mrb[7].mxu1 }
0x11b2   :  { %v884_v21 = vadd.f32 %v882_v19, %v1691_v14 }
0x11b4   :  { %1422 = vtanh.f32 %v884_v21  ;;  %v1146_v23 = vmul.f32 -1.442695, %v884_v21 }
0x11b6   :  { %1424 = vpow2.f32 %v1146_v23 }
0x11be   :  { %v1423_v22 = vpop.eup %1422 }
0x11bf   :  { %897 = vrot.lane.b32.xlu0 %v1423_v22, %s1565_s8 }
0x11c0   :  { %v1425_v24 = vpop.eup %1424 }
0x11c1   :  { %v888_v25 = vadd.f32 1.0, %v1425_v24 }
0x11c3   :  { %1426 = vrcp.f32 %v888_v25 }
0x11cd   :  { %v1427_v26 = vpop.eup %1426 }
0x11ce   :  { %v895_v29 = vmul.f32 %v1427_v26, %v893_v1 }
0x1231   :  { %v898_v27 = vpop.permute.xlu0 %897 }
0x1232   :  { %v900_v28 = vmul.f32 %v1427_v26, %v898_v27 }
0x1234   :  { %902 = vrot.lane.b32.xlu1 %v900_v28, %s1565_s8 }
0x12a6   :  { %v903_v30 = vpop.permute.xlu1 %902 }
0x12a7   :  { %v905_v31 = vadd.f32 %v903_v30, %v895_v29 }
0x12a9   :  { %1428 = vtanh.f32 %v905_v31  ;;  %v1000_v49 = vrot.slane %v905_v31, 7 }
0x12b3   :  { %v1429_v32 = vpop.eup %1428 }
0x12b4   :  { %908 = vrot.lane.b32.xlu0 %v1429_v32, %s1565_s8 }
0x1326   :  { %v909_v33 = vpop.permute.xlu0 %908 }
0x1327   :  { %v911_v34 = vmul.f32 %v1427_v26, %v909_v33 }
0x1329   :  { %v913_v35 = vrot.slane %v911_v34, 6  ;;  %v1030_v36 = vsel %vm1029_vm8, %v1028_v16, %v911_v34 }
0x132b   :  { %914 = vrot.lane.b32.xlu1 %v913_v35, %s1566_s3 }
0x139d   :  { %v915_v37 = vpop.permute.xlu1 %914 }
0x139e   :  { %1292 = vmatmul.mubr.msk.f32.vlgmr.msra.gmra.mrb[8].mxu0 %vm172_vm2, %v915_v37 }
0x1471   :  { %v984_v38 = vpop.f32.mrb[8].mxu0 }
0x1472   :  { %v989_v39 = vrot.slane %v984_v38, 1  ;;  %v1293_v40 = vpop.f32.mrb[9].mxu0 }
0x1474   :  { %v991_v41 = vadd.f32 %v989_v39, %v1691_v14  ;;  %v166_v14 = vld [vmem:[#allocation9] sm:$0xff] }
0x1475   :  { %v1357_v55 = vpack.c.bf16 %v167_v53, %v166_v14 }
0x1476   :  { %1430 = vtanh.f32 %v991_v41  ;;  %v1148_v43 = vmul.f32 -1.442695, %v991_v41 }
0x1477   :  { %1358 = vmatpush3.bf16.msra.mxu1 %v1357_v55 }
0x1478   :  { %1432 = vpow2.f32 %v1148_v43  ;;  %1359 = vmatprep.subr.bf16.mxu1 %v1562_v0 }
0x147b   :  { %1361 = vmatpush3.bf16.msra.mxu1 %v1360_v57 }
0x1480   :  { %v1431_v42 = vpop.eup %1430 }
0x1481   :  { %1004 = vrot.lane.b32.xlu0 %v1431_v42, %s1565_s8 }
0x1482   :  { %v1433_v44 = vpop.eup %1432 }
0x1483   :  { %v995_v45 = vadd.f32 1.0, %v1433_v44 }
0x1485   :  { %1434 = vrcp.f32 %v995_v45 }
0x148f   :  { %v1435_v46 = vpop.eup %1434 }
0x1490   :  { %v1002_v50 = vmul.f32 %v1435_v46, %v1000_v49 }
0x14f3   :  { %v1005_v47 = vpop.permute.xlu0 %1004 }
0x14f4   :  { %v1007_v48 = vmul.f32 %v1435_v46, %v1005_v47 }
0x14f6   :  { %1009 = vrot.lane.b32.xlu1 %v1007_v48, %s1565_s8 }
0x1568   :  { %v1010_v51 = vpop.permute.xlu1 %1009 }
0x1569   :  { %v1012_v52 = vadd.f32 %v1010_v51, %v1002_v50 }
0x156b   :  { %1436 = vtanh.f32 %v1012_v52 }
0x1575   :  { %v1437_v58 = vpop.eup %1436 }
0x1576   :  { %1015 = vrot.lane.b32.xlu0 %v1437_v58, %s1565_s8 }
0x15e8   :  { %v1016_v59 = vpop.permute.xlu0 %1015 }
0x15e9   :  { %v1018_v60 = vmul.f32 %v1435_v46, %v1016_v59 }
0x15eb   :  { %v1032_v61 = vsel %vm1031_vm9, %v1030_v36, %v1018_v60 }
0x15ec   :  { %1040 = vrot.lane.b32.xlu1 %v1032_v61, %s1566_s3 }
0x165e   :  { %v1041_v62 = vpop.permute.xlu1 %1040 }
0x165f   :  { %1303 = vmatmul.mubr.msk.f32.vlgmr.msra.gmra.mrb[8].mxu1 %vm172_vm2, %v1041_v62 }
0x1732   :  { %v1110_v0 = vpop.f32.mrb[8].mxu1 }
0x1733   :  { %v1111_v2 = vadd.f32 %v1149_v63, %v1110_v0  ;;  %v1304_v5 = vpop.f32.mrb[9].mxu1 }
0x1735   :  { %1114 = vst [vmem:[#allocation11] sm:$0xff] %v1111_v2 }
0x1736   :  { %1537 = shalt.err (!%p1534_p8)
}
0x1737   :  { %s1538_s28 = scalar_lea.hbm %s1798_s6, 128 }
0x1738   :  { %p1539_p9 = scmp.ne.s32.totalorder %s1798_s6, %s1538_s28  ;;  %p1542_p10 = scmp.lt.u32.totalorder %s1538_s28, %s1798_s6 }
0x173a   :  { %p1544_p11 = pnand %p1542_p10, %p1539_p9 }
0x173c   :  { %1547 = shalt.err (!%p1544_p11)
}
0x173d   :  { %1124 = dma.vmem_to_hbm [thread:$0]  %s1122_s24, 128, %s1798_s6, [#allocation5]  }
0x173e   :  { %1554 = dma.done.wait [#allocation5], 128  }
0x173f   :  { %1555 = vsyncadd [#allocation5], 4294967168 }
0x1740   :  { %1128 = vsyncpa [#allocation4], 1 }
0x1741   :  { %1129 = vsyncpa [#allocation7], 1 }
0x1742   :  { %1130 = vsyncpa [#allocation10], 1 }
0x1743   :  { %1131 = vsyncpa [#allocation5], 1 }

</bundles_post_ra>
